<compile_context>
chip_gen: v5e
topology: v5e:2x2
jax: 0.10.0
libtpu: 0.0.40
codegen_flags: <defaults>
</compile_context>

<pallas_src>
import functools

import jax
import jax.numpy as jnp
from jax import lax
from jax.experimental import pallas as pl
from jax.experimental.pallas import tpu as pltpu

# ---- module hyper-params (match ConvLayer defaults) -------------------------
KERNEL_SIZE = 3
PADDING = 1
STRIDE = 2
POOL_K = KERNEL_SIZE          # MaxPool1d(kernel_size, stride)
POOL_STRIDE = STRIDE
BN_EPS = 1e-5

# Set to jnp.bfloat16 on v6e / v7x to halve the input/weight HBM bytes and use the
# native bf16 MXU path; the __main__ check loosens its tolerance automatically.
MATMUL_DTYPE = jnp.float32

_LANE = 128
_VMEM_BUDGET = 24 * 1024 * 1024   # per-step working-set target (under the limit below)
_VMEM_LIMIT = 32 * 1024 * 1024    # >= scoped default on every generation, v7x-safe


def _conv_even_odd_fused(ph, wf, ne, no):
    """Fused-tap / fused-stream Conv1d(k=3, s=2, pad=1) for a block of samples.

    ph: (NB, 4, C, M4) phase-split padded input, ph[b, r, c, m] = x_pad[b, c, 4m+r]
    wf: (O, 3*C) with wf[:, k*C + c] = w[:, c, k]  (tap-major contraction order)

    Returns conv (NB, O, ne+no) f32: columns [0:ne] are even output positions
    0,2,...,2(ne-1); columns [ne:ne+no] are odd positions 1,3,...,2*no-1.
    One MXU matmul per sample (K = 3*C, T = ne+no lanes) instead of six tiny K=C dots.
    """
    nb, _, c, _ = ph.shape
    o = wf.shape[0]
    rhs_even = jnp.concatenate(
        [ph[:, 0, :, :ne], ph[:, 1, :, :ne], ph[:, 2, :, :ne]], axis=1)       # (NB,3C,ne)
    rhs_odd = jnp.concatenate(
        [ph[:, 2, :, :no], ph[:, 3, :, :no], ph[:, 0, :, 1:no + 1]], axis=1)  # (NB,3C,no)
    rhs = jnp.concatenate([rhs_even, rhs_odd], axis=2)                        # (NB,3C,T)
    wfb = jnp.broadcast_to(wf, (nb, o, 3 * c))
    return jnp.einsum('bok,bkt->bot', wfb, rhs,
                      preferred_element_type=jnp.float32)                     # (NB,O,T)


def _stats_kernel(ne, no, ph_ref, wf_ref, st_ref):
    """Partial BN statistics for one batch block.

    st_ref (2, O): row 0 = sum, row 1 = sum of squares of the conv output over
    (samples in block, all Lc positions), per output channel (channels in lanes).
    Zero-padded samples contribute exact zeros (no conv bias), so no masking needed.
    """
    conv = _conv_even_odd_fused(ph_ref[...], wf_ref[...], ne, no)      # (NB,O,Lc)
    s1 = jnp.sum(jnp.sum(conv, axis=2), axis=0, keepdims=True)         # (1, O)
    s2 = jnp.sum(jnp.sum(conv * conv, axis=2), axis=0, keepdims=True)  # (1, O)
    st_ref[...] = jnp.concatenate([s1, s2], axis=0)                    # (2, O)


def _apply_kernel(lp, lp_pad, ph_ref, wsc_ref, shift_ref, out_ref):
    """Conv (BN scale pre-folded into weights) + shift + ReLU + MaxPool(3, 2).

    Only the conv positions feeding the pool are recomputed: lp+1 even and lp odd.
    pooled[j] = max(act[2j], act[2j+1], act[2j+2]); output written lane-dense
    (last dim padded with zeros up to lp_pad, a multiple of 128), NCL layout.
    Elementwise math stays f32 (v5e-friendly) even if MATMUL_DTYPE is bf16.
    """
    conv = _conv_even_odd_fused(ph_ref[...], wsc_ref[...], lp + 1, lp)  # (NB,O,2lp+1)
    shift = shift_ref[...]                              # (O, 1) broadcast over lanes
    ae = jnp.maximum(conv[:, :, :lp + 1] + shift, 0.0)  # even conv positions 0..2lp
    ao = jnp.maximum(conv[:, :, lp + 1:] + shift, 0.0)  # odd positions 1..2lp-1
    pooled = jnp.maximum(jnp.maximum(ae[:, :, :lp], ao), ae[:, :, 1:lp + 1])
    if lp_pad > lp:
        nb, o = pooled.shape[0], pooled.shape[1]
        pooled = jnp.concatenate(
            [pooled, jnp.zeros((nb, o, lp_pad - lp), pooled.dtype)], axis=2)
    out_ref[...] = pooled.astype(out_ref.dtype)


def conv_layer_forward(x, w, b, gamma, beta):
    """x: (N, C_in, L); w: (O, C_in, 3); b/gamma/beta: (O,). Returns (N, O, L_pool)."""
    del b  # conv bias is exactly cancelled by training-mode BatchNorm mean subtraction
    n, c_in, l = x.shape
    o = w.shape[0]

    lc = (l + 2 * PADDING - KERNEL_SIZE) // STRIDE + 1
    lp = (lc - POOL_K) // POOL_STRIDE + 1
    if lp < 1:
        raise ValueError(f"input length {l} too short for conv + VALID max-pool")
    ne, no = (lc + 1) // 2, lc // 2              # ne + no == lc
    lp_pad = -(-lp // _LANE) * _LANE             # lane-dense output width
    m4 = -(-(l + 2 * PADDING) // 4)              # phase length (x_pad padded to 4*m4)

    # ---- samples per grid step: amortize per-step overhead, respect VMEM ----------
    in_bytes = jnp.dtype(MATMUL_DTYPE).itemsize
    per_sample = (2 * 4 * c_in * m4 * in_bytes   # double-buffered phase block
                  + 2 * o * lp_pad * 4           # double-buffered output block
                  + 3 * c_in * lc * in_bytes     # in-VMEM RHS
                  + 3 * o * lc * 4)              # conv + activation temporaries
    nb = max(1, min(8, n, _VMEM_BUDGET // max(per_sample, 1)))
    nb = min(nb, -(-n // 2))                     # keep >= 2 grid steps when N >= 2 (v7x)
    nblocks = -(-n // nb)
    n_pad = nb * nblocks

    # ---- layout prep (single stacked phase array; no 3x im2col expansion in HBM) --
    xp = jnp.pad(x, ((0, n_pad - n), (0, 0),
                     (PADDING, 4 * m4 - l - PADDING))).astype(MATMUL_DTYPE)
    xph = xp.reshape(n_pad, c_in, m4, 4).transpose(0, 3, 1, 2)   # (N_pad, 4, C, M4)

    # tap-major flattened weights: wflat[:, k*C + c] = w[:, c, k]
    wflat = jnp.transpose(w, (0, 2, 1)).reshape(o, KERNEL_SIZE * c_in).astype(MATMUL_DTYPE)

    ph_spec = pl.BlockSpec((nb, 4, c_in, m4), lambda i: (i, 0, 0, 0))
    w_spec = pl.BlockSpec((o, KERNEL_SIZE * c_in), lambda i: (0, 0))
    params = pltpu.CompilerParams(dimension_semantics=("parallel",),
                                  vmem_limit_bytes=_VMEM_LIMIT)

    # ---- pass 1: per-block partial BN statistics, (nblocks, 2, O) -----------------
    stats = pl.pallas_call(
        functools.partial(_stats_kernel, ne, no),
        out_shape=jax.ShapeDtypeStruct((nblocks, 2, o), jnp.float32),
        grid=(nblocks,),
        in_specs=[ph_spec, w_spec],
        out_specs=pl.BlockSpec((None, 2, o), lambda i: (i, 0, 0)),
        compiler_params=params,
    )(xph, wflat)

    # ---- tiny (O,)-sized BN fold in plain JAX --------------------------------------
    count = n * lc                               # real sample count (padding sums are 0)
    mean = jnp.sum(stats[:, 0, :], axis=0) / count
    ex2 = jnp.sum(stats[:, 1, :], axis=0) / count
    var = jnp.maximum(ex2 - mean * mean, 0.0)
    scale = gamma * lax.rsqrt(var + BN_EPS)
    shift = beta - mean * scale
    wscaled = (wflat.astype(jnp.float32) * scale[:, None]).astype(MATMUL_DTYPE)
    shift_col = shift.reshape(o, 1).astype(jnp.float32)

    # ---- pass 2: conv (scale folded) + shift + ReLU + MaxPool, lane-dense NCL ------
    out = pl.pallas_call(
        functools.partial(_apply_kernel, lp, lp_pad),
        out_shape=jax.ShapeDtypeStruct((n_pad, o, lp_pad), jnp.float32),
        grid=(nblocks,),
        in_specs=[ph_spec, w_spec, pl.BlockSpec((o, 1), lambda i: (0, 0))],
        out_specs=pl.BlockSpec((nb, o, lp_pad), lambda i: (i, 0, 0)),
        compiler_params=params,
    )(xph, wscaled, shift_col)
    return out[:n, :, :lp]


def conv_layer_reference(x, w, b, gamma, beta):
    """Pure-JAX reference matching the PyTorch module forward (training-mode BN)."""
    conv = lax.conv_general_dilated(
        x, w, window_strides=(STRIDE,), padding=[(PADDING, PADDING)],
        dimension_numbers=("NCH", "OIH", "NCH"), precision=lax.Precision.HIGHEST)
    conv = conv + b[None, :, None]
    mean = jnp.mean(conv, axis=(0, 2), keepdims=True)
    var = jnp.mean((conv - mean) ** 2, axis=(0, 2), keepdims=True)
    bn = (conv - mean) / jnp.sqrt(var + BN_EPS) * gamma[None, :, None] + beta[None, :, None]
    act = jnp.maximum(bn, 0.0)
    pooled = lax.reduce_window(act, -jnp.inf, lax.max,
                               (1, 1, POOL_K), (1, 1, POOL_STRIDE), "VALID")
    return pooled


if __name__ == "__main__":
    # Small shapes consistent with the module: x is (batch, input_size, length).
    N, C_IN, L, C_OUT = 2, 4, 16, 8

    key = jax.random.PRNGKey(0)
    kx, kw, kb, kg, kbt = jax.random.split(key, 5)
    x = jax.random.normal(kx, (N, C_IN, L), dtype=jnp.float32)
    w = jax.random.normal(kw, (C_OUT, C_IN, KERNEL_SIZE), dtype=jnp.float32) * 0.2
    b = jax.random.normal(kb, (C_OUT,), dtype=jnp.float32) * 0.1
    gamma = 1.0 + 0.1 * jax.random.normal(kg, (C_OUT,), dtype=jnp.float32)
    beta = 0.1 * jax.random.normal(kbt, (C_OUT,), dtype=jnp.float32)

    out = jax.block_until_ready(conv_layer_forward(x, w, b, gamma, beta))
    ref = jax.block_until_ready(conv_layer_reference(x, w, b, gamma, beta))

    assert out.shape == ref.shape, (out.shape, ref.shape)
    tol = 2e-3 if jnp.dtype(MATMUL_DTYPE) == jnp.dtype(jnp.float32) else 3e-2
    max_err = float(jnp.max(jnp.abs(out - ref)))
    assert jnp.allclose(out, ref, atol=tol, rtol=tol), max_err
    print("KERNEL_OK")
</pallas_src>

<mosaic_0001>
module attributes {stable_mosaic.version = 11 : i64} {
  func.func @_stats_kernel(%arg0: i32, %arg1: memref<1x4x4x5xf32, #tpu.memory_space<vmem>>, %arg2: memref<8x12xf32, #tpu.memory_space<vmem>>, %arg3: memref<1x2x8xf32, #tpu.memory_space<vmem>>) attributes {dimension_semantics = [#tpu.dimension_semantics<parallel>], iteration_bounds = array<i64: 2>, scalar_prefetch = 0 : i64, scratch_operands = 0 : i64, tpu.core_type = #tpu.core_type<tc>, window_params = [{transform_indices = @transform_0, window_bounds = array<i64: 1, 4, 4, 5>}, {pipeline_mode = #tpu.pipeline_mode<synchronous>, transform_indices = @transform_1, window_bounds = array<i64: 8, 12>}, {transform_indices = @transform_2, window_bounds = array<i64: 1, 2, 8>}]} {
    %c0 = arith.constant 0 : index
    %c0_0 = arith.constant 0 : index
    %c0_1 = arith.constant 0 : index
    %c0_2 = arith.constant 0 : index
    %0 = vector.load %arg1[%c0, %c0_0, %c0_1, %c0_2] : memref<1x4x4x5xf32, #tpu.memory_space<vmem>>, vector<1x4x4x5xf32>
    %c0_3 = arith.constant 0 : index
    %c0_4 = arith.constant 0 : index
    %1 = vector.load %arg2[%c0_3, %c0_4] : memref<8x12xf32, #tpu.memory_space<vmem>>, vector<8x12xf32>
    %2 = vector.extract_strided_slice %0 {offsets = [0, 0, 0, 0], sizes = [1, 1, 4, 4], strides = [1, 1, 1, 1]} : vector<1x4x4x5xf32> to vector<1x1x4x4xf32>
    %3 = vector.shape_cast %2 : vector<1x1x4x4xf32> to vector<1x4x4xf32>
    %4 = vector.extract_strided_slice %0 {offsets = [0, 1, 0, 0], sizes = [1, 1, 4, 4], strides = [1, 1, 1, 1]} : vector<1x4x4x5xf32> to vector<1x1x4x4xf32>
    %5 = vector.shape_cast %4 : vector<1x1x4x4xf32> to vector<1x4x4xf32>
    %6 = vector.extract_strided_slice %0 {offsets = [0, 2, 0, 0], sizes = [1, 1, 4, 4], strides = [1, 1, 1, 1]} : vector<1x4x4x5xf32> to vector<1x1x4x4xf32>
    %7 = vector.shape_cast %6 : vector<1x1x4x4xf32> to vector<1x4x4xf32>
    %8 = tpu.concatenate %3, %5, %7 in 1 : vector<1x4x4xf32>, vector<1x4x4xf32>, vector<1x4x4xf32> -> vector<1x12x4xf32>
    %9 = vector.extract_strided_slice %0 {offsets = [0, 2, 0, 0], sizes = [1, 1, 4, 4], strides = [1, 1, 1, 1]} : vector<1x4x4x5xf32> to vector<1x1x4x4xf32>
    %10 = vector.shape_cast %9 : vector<1x1x4x4xf32> to vector<1x4x4xf32>
    %11 = vector.extract_strided_slice %0 {offsets = [0, 3, 0, 0], sizes = [1, 1, 4, 4], strides = [1, 1, 1, 1]} : vector<1x4x4x5xf32> to vector<1x1x4x4xf32>
    %12 = vector.shape_cast %11 : vector<1x1x4x4xf32> to vector<1x4x4xf32>
    %13 = vector.extract_strided_slice %0 {offsets = [0, 0, 0, 1], sizes = [1, 1, 4, 4], strides = [1, 1, 1, 1]} : vector<1x4x4x5xf32> to vector<1x1x4x4xf32>
    %14 = vector.shape_cast %13 : vector<1x1x4x4xf32> to vector<1x4x4xf32>
    %15 = tpu.concatenate %10, %12, %14 in 1 : vector<1x4x4xf32>, vector<1x4x4xf32>, vector<1x4x4xf32> -> vector<1x12x4xf32>
    %16 = tpu.concatenate %8, %15 in 2 : vector<1x12x4xf32>, vector<1x12x4xf32> -> vector<1x12x8xf32>
    %17 = vector.shape_cast %1 : vector<8x12xf32> to vector<1x8x12xf32>
    "tpu.trace_start"() <{level = 10 : i32, message = "bok,bkt->bot"}> : () -> ()
    %cst = arith.constant dense<0.000000e+00> : vector<1x8x8xf32>
    %18 = tpu.matmul %17, %16, %cst {dimension_numbers = #tpu.dot_dimension_numbers<[2], [1], [1], [2], [0, 0, 0, 1, 1, 2], [0], [0]>} : vector<1x8x12xf32>, vector<1x12x8xf32>, vector<1x8x8xf32> -> vector<1x8x8xf32>
    "tpu.trace_stop"() : () -> ()
    %cst_5 = arith.constant dense<0.000000e+00> : vector<1x8xf32>
    %19 = vector.multi_reduction <add>, %18, %cst_5 [2] : vector<1x8x8xf32> to vector<1x8xf32>
    %cst_6 = arith.constant dense<0.000000e+00> : vector<8xf32>
    %20 = vector.multi_reduction <add>, %19, %cst_6 [0] : vector<1x8xf32> to vector<8xf32>
    %21 = vector.shape_cast %20 : vector<8xf32> to vector<1x8xf32>
    %22 = arith.mulf %18, %18 : vector<1x8x8xf32>
    %cst_7 = arith.constant dense<0.000000e+00> : vector<1x8xf32>
    %23 = vector.multi_reduction <add>, %22, %cst_7 [2] : vector<1x8x8xf32> to vector<1x8xf32>
    %cst_8 = arith.constant dense<0.000000e+00> : vector<8xf32>
    %24 = vector.multi_reduction <add>, %23, %cst_8 [0] : vector<1x8xf32> to vector<8xf32>
    %25 = vector.shape_cast %24 : vector<8xf32> to vector<1x8xf32>
    %26 = tpu.concatenate %21, %25 in 0 : vector<1x8xf32>, vector<1x8xf32> -> vector<2x8xf32>
    %c0_9 = arith.constant 0 : index
    %c0_10 = arith.constant 0 : index
    %c0_11 = arith.constant 0 : index
    %27 = vector.load %arg3[%c0_9, %c0_10, %c0_11] : memref<1x2x8xf32, #tpu.memory_space<vmem>>, vector<1x2x8xf32>
    %28 = vector.shape_cast %27 : vector<1x2x8xf32> to vector<2x8xf32>
    %29 = vector.shape_cast %26 : vector<2x8xf32> to vector<1x2x8xf32>
    tpu.vector_store %arg3[%c0_9, %c0_10, %c0_11], %29 {strides = array<i32>} : memref<1x2x8xf32, #tpu.memory_space<vmem>>, vector<1x2x8xf32>,
    return
  }
  func.func @transform_0(%arg0: i32) -> (i32, i32, i32, i32) {
    %c0_i32 = arith.constant 0 : i32
    %c0_i32_0 = arith.constant 0 : i32
    %c0_i32_1 = arith.constant 0 : i32
    %c0_i32_2 = arith.constant 0 : i32
    return %arg0, %c0_i32, %c0_i32_0, %c0_i32_1 : i32, i32, i32, i32
  }
  func.func @transform_1(%arg0: i32) -> (i32, i32) {
    %c0_i32 = arith.constant 0 : i32
    %c0_i32_0 = arith.constant 0 : i32
    %c0_i32_1 = arith.constant 0 : i32
    return %c0_i32, %c0_i32_0 : i32, i32
  }
  func.func @transform_2(%arg0: i32) -> (i32, i32, i32) {
    %c0_i32 = arith.constant 0 : i32
    %c0_i32_0 = arith.constant 0 : i32
    %c0_i32_1 = arith.constant 0 : i32
    return %arg0, %c0_i32, %c0_i32_0 : i32, i32, i32
  }
}

</mosaic_0001>

<bundles_post_ra>
// kernel: tpu_custom_call.1
= control target key start
LH: loop header
LB: loop body
LE: loop exit
PB: predicated region body
PF: predicated region fallthrough
CT: control target
= control target key end

     0   :  { %7 = vsyncpa [#allocation3], 0  ;;  %s725_s0 = inlined_call_operand.hbm [shape: f32[2,4,4,5], index: 0, kind: input, shape index: {}]   ;;  %s726_s1 = inlined_call_operand.hbm [shape: f32[8,12], index: 1, kind: input, shape index: {}]   ;;  %s727_s2 = inlined_call_operand.hbm [shape: f32[2,2,8], index: 2, kind: output, shape index: {}]  }
   0x1   :  { %9 = vsyncpa [#allocation3 + $0x1], 0 }
   0x2   :  { %10 = vsyncpa [#allocation6], 0 }
   0x3   :  { %11 = vsyncpa [#allocation4], 0 }
   0x4   :  { %13 = vsyncpa [#allocation4 + $0x1], 0  ;;  %s582_s9 = smov 0   ;;  %s584_s10 = smov 0  }
   0x5   :  { %s586_s11 = smov 0   ;;  %s588_s12 = smov 0  }
   0x6 LB: > { %s603_s13 = sadd.s32 4294967295, %s560_s12   ;;  %s351_s14 = sadd.s32 4294967294, %s560_s12   ;;  %s560_s12 = sphi %s588_s12, %s738_s12   ;;  %s556_s11 = sphi %s586_s11, %s737_s11   ;;  %s552_s10 = sphi %s584_s10, %s736_s10   ;;  %s548_s9 = sphi %s582_s9, %s735_s9  }
   0x7   : > { %s607_s15 = sadd.s32 1, %s560_s12   ;;  %s26_s16 = sadd.s32 1, %s556_s11 }
   0x8   : > { %s23_s17 = ssub.s32 %s560_s12, %s607_s15  ;;  %p33_p0 = scmp.ne.s32.totalorder %s556_s11, %s552_s10 }
   0x9   : > { %p24_p1 = scmp.eq.s32.totalorder %s23_s17, 0  ;;  %p34_p2 = scmp.eq.s32.totalorder %s560_s12, 0 }
   0xa   : > { %p39_p3 = scmp.ne.s32.totalorder %s552_s10, %s548_s9  ;;  %p40_p4 = scmp.eq.s32.totalorder %s603_s13, 0 }
   0xb   : > { %s619_s18 = scalar_select %p24_p1, %s556_s11, %s26_s16  }
   0xc   : > { %p621_p5 = por %p34_p2, %p33_p0  ;;  %p627_p6 = por %p40_p4, %p39_p3 }
   0xd   : > { %p84_p7 = scmp.eq.s32.totalorder %s603_s13, 1  ;;  %p90_p8 = scmp.eq.s32.totalorder %s351_s14, 1 }
   0xe   : > { %p352_p9 = scmp.ge.s32.totalorder %s560_s12, 1  ;;  %p97_p10 = scmp.lt.s32.totalorder %s560_s12, 3 }
   0xf   : > { %p634_p11 = por %p84_p7, %p33_p0  ;;  %p638_p12 = por %p90_p8, %p39_p3 }
  0x10   : > { %p642_p13 = pnand %p352_p9, %p97_p10  ;;  %s109_s26 = sshll.u32 %s726_s1, 4  ;;  %s110_s26 = int_to_ptr.hbm [resolvable:$true] %s109_s26 }
  0x11   : > { %s562_s27 = smov [#allocation5]   ;;  %p390_p3 = scmp.lt.s32.totalorder %s560_s12, 2 }
  0x12   : > { %p377_p1 = pneg %p642_p13  ;;  %s111_s28 = sshll.u32 %s562_s27, 4  ;;  %s112_s28 = int_to_ptr.vmem [resolvable:$true] %s111_s28 }
  0x13   : > { %s122_s29 = sand.u32 1, %s556_s11   ;;  %p658_p7 = pnand %p390_p3, %p621_p5 }
  0x14   : > { %p378_p2 = pnand %p377_p1, %p40_p4  ;;  %s355_s3 = sshll.u32 %s122_s29, 4 }
  0x15   : > { %s368_s4 = sshll.u32 %s560_s12, 4  ;;  %s126_s14 = scalar_lea.vmem [#allocation2], %s355_s3 }
  0x16   : > { %380 = dma.hbm_to_vmem [thread:$0]  (!%p378_p2), %s110_s26, 128, %s112_s28, [#allocation6]  }
  0x17   : > { %s131_s7 = scalar_lea.hbm %s725_s0, %s368_s4  ;;  %s134_s16 = sshll.u32 %s126_s14, 4  ;;  %s135_s16 = int_to_ptr.vmem [resolvable:$true] %s134_s16 }
  0x18   : > { %s132_s8 = sshll.u32 %s131_s7, 4  ;;  %s123_s17 = scalar_lea.sflag [#allocation3], %s122_s29  ;;  %s133_s8 = int_to_ptr.hbm [resolvable:$true] %s132_s8 }
  0x19   : > { %s460_s24 = sshra.s32 %s133_s8, 4  ;;  %p464_p8 = pneg %p658_p7  ;;  %s461_s24 = int_to_ptr.hbm [resolvable:$true] %s460_s24 }
  0x1a   : > { %s462_s19 = scalar_lea.hbm %s461_s24, 16  ;;  %s467_s27 = scalar_lea.hbm %s725_s0, 32 }
  0x1b   : > { %p463_p5 = scmp.ne.s32.totalorder %s461_s24, %s462_s19  ;;  %p468_p1 = scmp.lt.s32.totalorder %s461_s24, %s725_s0 }
  0x1c   : > { %p469_p2 = scmp.lt.s32.totalorder %s467_s27, %s462_s19 }
  0x1d   : > { %p465_p9 = pnand %p464_p8, %p463_p5 }
  0x1e   : > { %p470_p3 = por %p469_p2, %p468_p1 }
  0x1f   : > { %p466_p10 = pneg %p465_p9 }
  0x21   : > { %p471_p0 = pnand %p470_p3, %p466_p10 }
  0x23   : > { %474 = shalt.err (!%p471_p0)
}
  0x24   : > { %s563_s29 = smov 64   ;;  %s564_s3 = smov 4  }
  0x25   : > { %384 = dma.hbm_to_vmem [thread:$0]  (!%p658_p7), %s133_s8, 256, %s135_s16, %s123_s17, %s563_s29, %s563_s29, %s564_s3  }
  0x26   : > { %146 = sbr.rel (%p642_p13) target bundleno = 532 (0x214), region = 28  ;;  %s679_s5 = sand.u32 (!%p642_p13), 1, %s552_s10  }
  0x27   : > { %s359_s6 = sshll.u32 (!%p642_p13), %s679_s5, 4  ;;  %s149_s7 = scalar_lea.sflag (!%p642_p13), [#allocation3], %s679_s5 }
  0x28   : > { %s152_s14 = scalar_lea.vmem (!%p642_p13), [#allocation2], %s359_s6 }
  0x2b   : > { %535 = dma.done.wait (%p627_p6), %s149_s7, 256  }
  0x2c   : > { %537 = vsyncadd (%p627_p6), %s149_s7, 4294967040 }
  0x2d   : > { %539 = dma.done.wait (%p40_p4), [#allocation6], 128  }
  0x2e   : > { %541 = vsyncadd (%p40_p4), [#allocation6], 4294967168  ;;  %v179_v0 = vld [vmem:[%s152_s14] sm:$0xf]  ;;  %s565_s23 = smov 127   ;;  %vm187_vm0 = vcmask 1043456   ;;  %v244_v18 = vlaneseq }
  0x2f   : > { %193 = vrot.lane.b32.xlu0 %v179_v0, %s565_s23  ;;  %v182_v1 = vld [vmem:[%s152_s14 + $0xc] sm:$0xf]  ;;  %v181_v3 = vld [vmem:[%s152_s14 + $0x8] sm:$0xf]  ;;  %s566_s30 = smov 4   ;;  %vm203_vm1 = vcmask 31744  }
  0x30   : > { %v190_v2 = vrot.slane %v182_v1, 4  ;;  %v180_v6 = vld [vmem:[%s152_s14 + $0x4] sm:$0xf]  ;;  %vm206_vm2 = vcmask 97280   ;;  %vm233_vm3 = vcmask 64512   ;;  %s361_s20 = sshll.u32 %s679_s5, 1 }
  0x31   : > { %v185_v7 = vrot.slane %v180_v6, 4  ;;  %v183_v13 = vld [vmem:[#allocation5] sm:$0xff]  ;;  %s365_s8 = sshll.u32 %s603_s13, 1  ;;  %v245_v19 = vand.u32 127, %v244_v18  ;;  %s178_s19 = scalar_lea.vmem [#allocation7], %s361_s20  ;;  %vm251_vm4 = vcmask 1040384  }
  0x32   : > { %v195_v4 = vsel %vm187_vm0, %v181_v3, %v190_v2  ;;  %s266_s24 = scalar_lea.hbm %s727_s2, %s365_s8  ;;  %s268_s25 = sshll.u32 %s178_s19, 4  ;;  %vm253_vm5 = vcmask 58368   ;;  %s269_s25 = int_to_ptr.vmem [resolvable:$true] %s268_s25 }
  0x33   : > { %197 = vrot.lane.b32.xlu1 %v195_v4, %s566_s30  ;;  %v188_v9 = vsel %vm187_vm0, %v179_v0, %v185_v7  ;;  %s270_s26 = sshll.u32 %s266_s24, 4  ;;  %s256_s13 = scalar_lea.sflag [#allocation4], %s679_s5  ;;  %s271_s26 = int_to_ptr.hbm [resolvable:$true] %s270_s26 }
  0x34   : > { %s504_s27 = sshra.s32 %s271_s26, 4  ;;  %s510_s3 = scalar_lea.hbm %s727_s2, 4  ;;  %s505_s27 = int_to_ptr.hbm [resolvable:$true] %s504_s27 }
  0x35   : > { %s506_s28 = scalar_lea.hbm %s505_s27, 2  ;;  %p511_p0 = scmp.lt.s32.totalorder %s505_s27, %s727_s2 }
  0x36   : > { %p507_p4 = scmp.ne.s32.totalorder %s505_s27, %s506_s28  ;;  %p512_p7 = scmp.lt.s32.totalorder %s510_s3, %s506_s28 }
  0x38   : > { %p508_p6 = pnand %p507_p4, %p634_p11  ;;  %p513_p5 = por %p512_p7, %p511_p0 }
  0x3a   : > { %p509_p13 = pneg %p508_p6 }
  0x3c   : > { %p514_p8 = pnand %p513_p5, %p509_p13 }
  0xa1   : > { %v194_v5 = vpop.permute.xlu0 %193 }
  0xa2   : > { %199 = vrot.lane.b32.xlu0 %v194_v5, %s566_s30 }
  0xa5   : > { %v198_v8 = vpop.permute.xlu1 %197 }
  0xa6   : > { %v204_v12 = vsel %vm203_vm1, %v188_v9, %v198_v8 }
 0x114   : > { %v200_v10 = vpop.permute.xlu0 %199 }
 0x115   : > { %v205_v11 = vsel %vm203_vm1, %v181_v3, %v200_v10 }
 0x116   : > { %362 = vmatpush.msk.msra.mxu0 %vm187_vm0, %v205_v11 }
 0x118   : > { %228 = vmatpush.msra.mxu0 %v204_v12 }
 0x119   : > { %363 = vmatmul.msk.f32.vlgmr.msra.gmra.mxu0 %vm206_vm2, %v183_v13 }
 0x196   : > { %v230_v14 = vpop.f32.mrf.mxu0 }
 0x197   : > { %v238_v15 = vmul.f32 %v230_v14, %v230_v14  ;;  %v234_v16 = vsel %vm233_vm3, %v230_v14, 0.0 }
 0x198   : > { %235 = vadd.xlane.f32.xlu1 %v234_v16 }
 0x199   : > { %v239_v17 = vsel %vm233_vm3, %v238_v15, 0.0 }
 0x19a   : > { %240 = vadd.xlane.f32.xlu2 %v239_v17 }
 0x20b   : > { %v236_v20 = vpop.xlane.xlu1 %235 }
 0x20c   : > { %v246_v22 = vperm.slane %v236_v20, %v245_v19 }
 0x20d   : > { %v241_v21 = vpop.xlane.xlu2 %240 }
 0x20e   : > { %v249_v23 = vperm.slane %v241_v21, %v245_v19 }
 0x210   : > { %v252_v24 = vsel %vm251_vm4, %v246_v22, %v249_v23 }
 0x211   : > { %254 = vst.msk [vmem:[%s178_s19] sm:$0x3] %vm253_vm5, %v252_v24 }
 0x212   : > { %517 = shalt.err (!%p514_p8)
}
 0x213   : > { %375 = dma.vmem_to_hbm [thread:$0]  (%p634_p11), %s269_s25, 32, %s271_s26, %s256_s13  }
 0x214 PF: > { %s282_s5 = sand.u32 1, %s548_s9   ;;  %p734_p9 = scmp.ge.s32.totalorder %s560_s12, 2 }
 0x215   : > { %s283_s14 = scalar_lea.sflag [#allocation4], %s282_s5 }
 0x216   : > { %p386_p10 = pnand %p734_p9, %p638_p12 }
 0x218   : > { %p387_p1 = pneg %p386_p10 }
 0x21a   : > { %543 = dma.done.wait (%p387_p1), %s283_s14, 32  }
 0x21b   : > { %545 = vsyncadd (%p387_p1), %s283_s14, 4294967264  ;;  %p16_p2 = scmp.ge.s32.totalorder %s607_s15, 4   ;;  %s735_s9 = smov %s552_s10 }
 0x21c   : > { %s736_s10 = smov %s556_s11  ;;  %s737_s11 = smov %s619_s18 }
 0x21d   : > { %s738_s12 = smov %s607_s15  ;;  %18 = sbr.rel (!%p16_p2) target bundleno = 6 (0x6), region = 77 }
 0x222   :  { %289 = vsyncpa [#allocation3], 1 }
 0x223   :  { %291 = vsyncpa [#allocation3 + $0x1], 1 }
 0x224   :  { %292 = vsyncpa [#allocation6], 1 }
 0x225   :  { %293 = vsyncpa [#allocation4], 1 }
 0x226   :  { %295 = vsyncpa [#allocation4 + $0x1], 1 }

</bundles_post_ra>
